<compile_context>
chip_gen: v7x
topology: tpu7x:2x2x1
jax: 0.10.0
libtpu: 0.0.40
codegen_flags: <defaults>
</compile_context>

<pallas_src>
import jax
import jax.numpy as jnp
from jax.experimental import pallas as pl
from jax.experimental.pallas import tpu as pltpu

IN_FEATURES = 32
OUT_FEATURES = 32
_LANE_TILE = 512  # max batch tile on the 128-lane axis (multiple of 128)


def _round_up(n: int, m: int) -> int:
    return ((n + m - 1) // m) * m


def _linear_kernel(w_ref, xt_ref, o_ref):
    # w_ref:  (OUT, IN)  resident weight tile
    # xt_ref: (IN,  TN)  x.T tile (batch on the lane axis)
    # o_ref:  (OUT, TN)  y.T tile (lane-dense output)
    o_ref[...] = jnp.dot(
        w_ref[...], xt_ref[...], preferred_element_type=jnp.float32
    ).astype(o_ref.dtype)


def linear_no_bias(x: jax.Array, weight: jax.Array) -> jax.Array:
    """y = x @ weight.T  (weight in PyTorch (out_features, in_features) layout)."""
    batch, in_f = x.shape
    out_f = weight.shape[0]
    out_dtype = x.dtype

    # Batch tile: multiple of 128 lanes, capped at _LANE_TILE.
    tn = min(_LANE_TILE, _round_up(batch, 128))
    padded = _round_up(batch, tn)

    # Transposed problem: batch goes on the 128-lane axis.
    xt = x.T  # (in, batch) -- layout plumbing in plain JAX
    if padded != batch:
        xt = jnp.pad(xt, ((0, 0), (0, padded - batch)))

    grid = (padded // tn,)

    itemsize = jnp.dtype(out_dtype).itemsize
    cost = pl.CostEstimate(
        flops=2 * padded * in_f * out_f,
        transcendentals=0,
        bytes_accessed=(in_f * padded + out_f * in_f + out_f * padded) * itemsize,
    )

    yt = pl.pallas_call(
        _linear_kernel,
        out_shape=jax.ShapeDtypeStruct((out_f, padded), out_dtype),
        grid=grid,
        in_specs=[
            pl.BlockSpec((out_f, in_f), lambda i: (0, 0)),  # weight, same block every step
            pl.BlockSpec((in_f, tn), lambda i: (0, i)),     # x.T batch tile
        ],
        out_specs=pl.BlockSpec((out_f, tn), lambda i: (0, i)),
        compiler_params=pltpu.CompilerParams(
            dimension_semantics=("parallel",),  # independent batch tiles (v7x dual-TC)
        ),
        cost_estimate=cost,
    )(weight, xt)

    # Un-transpose (and drop lane padding) in the wrapper.
    return yt[:, :batch].T


if __name__ == "__main__":
    key = jax.random.PRNGKey(0)
    kx, kw, kx2 = jax.random.split(key, 3)

    # Deterministic weight init, PyTorch Linear shape (out_features, in_features)
    bound = 1.0 / (IN_FEATURES ** 0.5)
    weight = jax.random.uniform(
        kw, (OUT_FEATURES, IN_FEATURES), dtype=jnp.float32,
        minval=-bound, maxval=bound,
    )

    # Primary case: matches Sub.example_inputs() -> (1, 32) float32
    x = jax.random.normal(kx, (1, IN_FEATURES), dtype=jnp.float32)
    y = linear_no_bias(x, weight)
    jax.block_until_ready(y)
    y_ref = x @ weight.T
    assert y.shape == (1, OUT_FEATURES)
    assert y.dtype == x.dtype
    assert jnp.allclose(y, y_ref, atol=1e-5, rtol=1e-5)

    # Larger batch exercises the tiled, multi-step "parallel" grid path.
    x_big = jax.random.normal(kx2, (1024, IN_FEATURES), dtype=jnp.float32)
    y_big = linear_no_bias(x_big, weight)
    jax.block_until_ready(y_big)
    y_big_ref = x_big @ weight.T
    assert y_big.shape == (1024, OUT_FEATURES)
    assert jnp.allclose(y_big, y_big_ref, atol=1e-4, rtol=1e-4)

    print("KERNEL_OK")
</pallas_src>

<mosaic_0001>
module attributes {stable_mosaic.version = 11 : i64} {
  func.func @_linear_kernel(%arg0: i32, %arg1: memref<32x32xf32, #tpu.memory_space<vmem>>, %arg2: memref<32x128xf32, #tpu.memory_space<vmem>>, %arg3: memref<32x128xf32, #tpu.memory_space<vmem>>) attributes {dimension_semantics = [#tpu.dimension_semantics<parallel>], iteration_bounds = array<i64: 1>, scalar_prefetch = 0 : i64, scratch_operands = 0 : i64, tpu.core_type = #tpu.core_type<tc>, window_params = [{pipeline_mode = #tpu.pipeline_mode<synchronous>, transform_indices = @transform_0, window_bounds = array<i64: 32, 32>}, {transform_indices = @transform_1, window_bounds = array<i64: 32, 128>}, {transform_indices = @transform_2, window_bounds = array<i64: 32, 128>}]} {
    %c0 = arith.constant 0 : index
    %c0_0 = arith.constant 0 : index
    %0 = vector.load %arg1[%c0, %c0_0] : memref<32x32xf32, #tpu.memory_space<vmem>>, vector<32x32xf32>
    %c0_1 = arith.constant 0 : index
    %c0_2 = arith.constant 0 : index
    %1 = vector.load %arg2[%c0_1, %c0_2] : memref<32x128xf32, #tpu.memory_space<vmem>>, vector<32x128xf32>
    %cst = arith.constant dense<0.000000e+00> : vector<32x128xf32>
    %2 = tpu.matmul %0, %1, %cst {dimension_numbers = #tpu.dot_dimension_numbers<[1], [0], [0], [1], [0, 0, 1, 1], [], []>} : vector<32x32xf32>, vector<32x128xf32>, vector<32x128xf32> -> vector<32x128xf32>
    %c0_3 = arith.constant 0 : index
    %c0_4 = arith.constant 0 : index
    %3 = vector.load %arg3[%c0_3, %c0_4] : memref<32x128xf32, #tpu.memory_space<vmem>>, vector<32x128xf32>
    tpu.vector_store %arg3[%c0_3, %c0_4], %2 {strides = array<i32>} : memref<32x128xf32, #tpu.memory_space<vmem>>, vector<32x128xf32>,
    return
  }
  func.func @transform_0(%arg0: i32) -> (i32, i32) {
    %c0_i32 = arith.constant 0 : i32
    %c0_i32_0 = arith.constant 0 : i32
    %c0_i32_1 = arith.constant 0 : i32
    return %c0_i32, %c0_i32_0 : i32, i32
  }
  func.func @transform_1(%arg0: i32) -> (i32, i32) {
    %c0_i32 = arith.constant 0 : i32
    %c0_i32_0 = arith.constant 0 : i32
    return %c0_i32, %arg0 : i32, i32
  }
  func.func @transform_2(%arg0: i32) -> (i32, i32) {
    %c0_i32 = arith.constant 0 : i32
    %c0_i32_0 = arith.constant 0 : i32
    return %c0_i32, %arg0 : i32, i32
  }
}

</mosaic_0001>

<bundles_post_ra>
// kernel: tpu_custom_call.1
= control target key start
LH: loop header
LB: loop body
LE: loop exit
PB: predicated region body
PF: predicated region fallthrough
CT: control target
= control target key end

     0   :  { %7 = vsyncpa [#allocation3], 0  ;;  %s352_s0 = inlined_call_operand.hbm [shape: f32[32,32], index: 0, kind: input, shape index: {}]   ;;  %s353_s1 = inlined_call_operand.hbm [shape: f32[32,128], index: 1, kind: input, shape index: {}]   ;;  %s354_s2 = inlined_call_operand.hbm [shape: f32[32,128], index: 2, kind: output, shape index: {}]  }
   0x1   :  { %8 = vsyncpa [#allocation6], 0 }
   0x2   :  { %9 = vsyncpa [#allocation4], 0  ;;  %s283_s9 = smov [#allocation2]   ;;  %s211_s13 = scalar_lea.hbm %s352_s0, 512 }
   0x3   :  { %s15_s10 = sshll.u32 %s283_s9, 4  ;;  %p212_p0 = scmp.ne.s32.totalorder %s352_s0, %s211_s13  ;;  %s16_s10 = int_to_ptr.vmem [resolvable:$true] %s15_s10 }
   0x4   :  { %p215_p1 = scmp.lt.u32.totalorder %s211_s13, %s352_s0 }
   0x6   :  { %p217_p2 = pnand %p215_p1, %p212_p0 }
   0x8   :  { %220 = shalt.err (!%p217_p2)
}
   0x9   :  { %s221_s18 = scalar_lea.vmem %s16_s10, 512  ;;  %p226_p4 = scmp.lt.s32.totalorder %s16_s10, %s16_s10 }
   0xa   :  { %p222_p3 = scmp.ne.s32.totalorder %s16_s10, %s221_s18  ;;  %p227_p5 = scmp.lt.s32.totalorder %s221_s18, %s221_s18 }
   0xc   :  { %p228_p6 = por %p227_p5, %p226_p4 }
   0xe   :  { %p229_p7 = pnand %p228_p6, %p222_p3 }
  0x10   :  { %232 = shalt.err (!%p229_p7)
}
  0x11   :  { %s284_s19 = smov 128   ;;  %s285_s20 = smov 8  }
  0x12   :  { %21 = dma.hbm_to_vmem [thread:$0]  %s352_s0, 512, %s16_s10, [#allocation3], %s284_s19, %s284_s19, %s285_s20  }
  0x13   :  { %s286_s23 = smov [#allocation5]   ;;  %s233_s27 = scalar_lea.hbm %s353_s1, 512 }
  0x14   :  { %s27_s24 = sshll.u32 %s286_s23, 4  ;;  %p234_p8 = scmp.ne.s32.totalorder %s353_s1, %s233_s27  ;;  %s28_s24 = int_to_ptr.vmem [resolvable:$true] %s27_s24 }
  0x15   :  { %p237_p9 = scmp.lt.u32.totalorder %s233_s27, %s353_s1 }
  0x17   :  { %p239_p10 = pnand %p237_p9, %p234_p8 }
  0x19   :  { %242 = shalt.err (!%p239_p10)
}
  0x1a   :  { %s243_s4 = scalar_lea.vmem %s28_s24, 512  ;;  %p248_p12 = scmp.lt.s32.totalorder %s28_s24, %s28_s24 }
  0x1b   :  { %p244_p11 = scmp.ne.s32.totalorder %s28_s24, %s243_s4  ;;  %p249_p13 = scmp.lt.s32.totalorder %s243_s4, %s243_s4 }
  0x1d   :  { %p250_p0 = por %p249_p13, %p248_p12 }
  0x1f   :  { %p251_p1 = pnand %p250_p0, %p244_p11 }
  0x21   :  { %254 = shalt.err (!%p251_p1)
}
  0x22   :  { %33 = dma.hbm_to_vmem [thread:$0]  %s353_s1, 512, %s28_s24, [#allocation6], %s284_s19, %s284_s19, %s285_s20  }
  0x23   :  { %277 = dma.done.wait [#allocation3], 512  }
  0x24   :  { %278 = vsyncadd [#allocation3], 4294966784 }
  0x25   :  { %279 = dma.done.wait [#allocation6], 512  }
  0x26   :  { %280 = vsyncadd [#allocation6], 4294966784  ;;  %vm48_vm0 = vcmask 261120   ;;  %v44_v0 = vld [vmem:[#allocation5] sm:$0xff]  ;;  %v45_v1 = vld [vmem:[#allocation5 + $0x8] sm:$0xff]  ;;  %s287_s1 = smov [#allocation7]  }
  0x27   :  { %v46_v2 = vld [vmem:[#allocation5 + $0x10] sm:$0xff]  ;;  %v194_v3 = vpack.c.bf16 %v45_v1, %v44_v0  ;;  %v47_v4 = vld [vmem:[#allocation5 + $0x18] sm:$0xff]  ;;  %v40_v5 = vld [vmem:[#allocation2] sm:$0xff]  ;;  %s155_s6 = sshll.u32 %s287_s1, 4  ;;  %s156_s6 = int_to_ptr.vmem [resolvable:$true] %s155_s6 }
  0x28   :  { %v42_v6 = vld [vmem:[#allocation2 + $0x10] sm:$0xff]  ;;  %v198_v7 = vpack.c.bf16 %v47_v4, %v46_v2  ;;  %188 = vmatprep.mubr.msk.f32.mxu0 %vm48_vm0, %v40_v5  ;;  %v41_v8 = vld [vmem:[#allocation2 + $0x8] sm:$0xff]  ;;  %v43_v9 = vld [vmem:[#allocation2 + $0x18] sm:$0xff]  ;;  %s255_s7 = scalar_lea.vmem %s156_s6, 512  ;;  %p260_p3 = scmp.lt.s32.totalorder %s156_s6, %s156_s6 }
  0x29   :  { %191 = vmatprep.mubr.msk.f32.mxu1 %vm48_vm0, %v42_v6  ;;  %195 = vmatprep.subr.bf16.mxu0 %v194_v3  ;;  %p256_p2 = scmp.ne.s32.totalorder %s156_s6, %s255_s7  ;;  %p261_p4 = scmp.lt.s32.totalorder %s255_s7, %s255_s7 }
  0x2a   :  { %202 = vmatprep.subr.bf16.mxu1 %v194_v3  ;;  %197 = vmatpush3.bf16.msra.mxu0 %v194_v3 }
  0x2b   :  { %204 = vmatpush3.bf16.msra.mxu1 %v194_v3  ;;  %199 = vmatprep.subr.bf16.mxu0 %v198_v7  ;;  %p262_p5 = por %p261_p4, %p260_p3 }
  0x2c   :  { %203 = vmatprep.subr.bf16.mxu1 %v198_v7 }
  0x2d   :  { %p263_p6 = pnand %p262_p5, %p256_p2 }
  0x2e   :  { %201 = vmatpush3.bf16.msra.mxu0 %v198_v7 }
  0x2f   :  { %205 = vmatpush3.bf16.msra.mxu1 %v198_v7 }
  0x31   :  { %189 = vmatmul.mubr.msk.f32.vlgmr.msra.gmra.mrb[0].mxu0 %vm48_vm0, %v41_v8 }
  0x32   :  { %192 = vmatmul.mubr.msk.f32.vlgmr.msra.gmra.mrb[0].mxu1 %vm48_vm0, %v43_v9 }
 0x104   :  { %v190_v10 = vpop.f32.mrb[0].mxu0 }
 0x105   :  { %v193_v11 = vpop.f32.mrb[0].mxu1  ;;  %147 = vst [vmem:[#allocation7 + $0x8] sm:$0xff] %v190_v10  ;;  %v127_v12 = vpop.f32.mrb[1].mxu0 }
 0x106   :  { %149 = vst [vmem:[#allocation7 + $0x18] sm:$0xff] %v193_v11  ;;  %v137_v13 = vpop.f32.mrb[1].mxu1  ;;  %146 = vst [vmem:[#allocation7] sm:$0xff] %v127_v12 }
 0x107   :  { %148 = vst [vmem:[#allocation7 + $0x10] sm:$0xff] %v137_v13 }
 0x108   :  { %266 = shalt.err (!%p263_p6)
}
 0x109   :  { %s267_s10 = scalar_lea.hbm %s354_s2, 512 }
 0x10a   :  { %p268_p7 = scmp.ne.s32.totalorder %s354_s2, %s267_s10  ;;  %p271_p8 = scmp.lt.u32.totalorder %s267_s10, %s354_s2 }
 0x10c   :  { %p273_p9 = pnand %p271_p8, %p268_p7 }
 0x10e   :  { %276 = shalt.err (!%p273_p9)
}
 0x10f   :  { %161 = dma.vmem_to_hbm [thread:$0]  %s156_s6, 512, %s354_s2, [#allocation4], %s284_s19, %s284_s19, %s285_s20  }
 0x110   :  { %281 = dma.done.wait [#allocation4], 512  }
 0x111   :  { %282 = vsyncadd [#allocation4], 4294966784 }
 0x112   :  { %165 = vsyncpa [#allocation3], 1 }
 0x113   :  { %166 = vsyncpa [#allocation6], 1 }
 0x114   :  { %167 = vsyncpa [#allocation4], 1 }

</bundles_post_ra>
